<compile_context>
chip_gen: v7x
topology: tpu7x:2x2x1
jax: 0.10.0
libtpu: 0.0.40
codegen_flags: <defaults>
</compile_context>

<pallas_src>
import math
import numpy as np
import jax
import jax.numpy as jnp
from jax.experimental import pallas as pl
from jax.experimental.pallas import tpu as pltpu


# ----------------------------- glue helpers -----------------------------

def _round_up(x, m):
    return ((x + m - 1) // m) * m


def linear_interp_matrix(src_len: int, dst_len: int) -> np.ndarray:
    """W (src_len, dst_len) s.t. y = x @ W reproduces
    F.interpolate(x, dst_len, mode='linear', align_corners=False)."""
    scale = src_len / dst_len
    j = np.arange(dst_len)
    src = (j + 0.5) * scale - 0.5
    src = np.clip(src, 0.0, None)
    i0 = np.minimum(np.floor(src).astype(np.int64), src_len - 1)
    i1 = np.minimum(i0 + 1, src_len - 1)
    w1 = (src - i0).astype(np.float32)
    w0 = (1.0 - w1).astype(np.float32)
    W = np.zeros((src_len, dst_len), dtype=np.float32)
    W[i0, j] += w0
    W[i1, j] += w1
    return W


def _gelu_exact(x):
    # exact (erf) GELU, matching torch.nn.functional.gelu default
    return 0.5 * x * (1.0 + jax.lax.erf(x * (1.0 / math.sqrt(2.0))))


def _gelu_tanh(x):
    # tanh approximation -> EUP slot (overlaps with VALU/MXU work)
    return jax.nn.gelu(x, approximate=True)


# ----------------------------- Pallas kernel -----------------------------

def _make_kernel(C, K, dilation, t_tile, halo_w, compute_dtype,
                 fuse_taps, write_halo, approx_gelu):
    pad = (K - 1) * dilation
    cd = compute_dtype
    cat_w = t_tile + halo_w
    gelu = _gelu_tanh if approx_gelu else _gelu_exact

    def kernel(x_ref, c_ref, interp_ref, wfilm_ref, bfilm_ref,
               wc1_ref, bc1_ref, wc2_ref, bc2_ref,
               out_ref, fc_ref, prev1_ref, prev2_ref):
        t = pl.program_id(1)

        # Start of every sequence: hoist the FiLM cond-projection out of the
        # T loop (fc = wfilm @ cond), and reset the causal halo carry.
        @pl.when(t == 0)
        def _():
            fc_ref[...] = jnp.dot(wfilm_ref[...],
                                  c_ref[0].astype(jnp.float32),
                                  preferred_element_type=jnp.float32)
            prev1_ref[...] = jnp.zeros_like(prev1_ref)
            prev2_ref[...] = jnp.zeros_like(prev2_ref)

        x = x_ref[0].astype(jnp.float32)                       # (C, Tt)

        # ---- FiLM per tile: one small f32 matmul against the interp slab ----
        mods = jnp.dot(fc_ref[...], interp_ref[...],
                       preferred_element_type=jnp.float32) + bfilm_ref[...]
        scale1 = mods[0 * C:1 * C]
        shift1 = mods[1 * C:2 * C]
        scale2 = mods[2 * C:3 * C]
        shift2 = mods[3 * C:4 * C]

        def causal_conv(h, prev_ref, wc_ref, bc_ref):
            # Causality via a HALO-lane carry: each tap is a single XLU roll
            # of [halo | h] followed by a lane-aligned static slice.
            h_cd = h.astype(cd)
            h_cat = jnp.concatenate([prev_ref[...], h_cd], axis=1)  # (C, halo+Tt)

            def tap(k):
                s = pad - k * dilation            # static shift, 0..pad
                if s == 0:
                    return h_cd
                shift = (t_tile + s) % cat_w
                return pltpu.roll(h_cat, shift, 1)[:, :t_tile]

            if fuse_taps:
                taps = jnp.concatenate([tap(k) for k in range(K)], axis=0)
                y = jnp.dot(wc_ref[...], taps,
                            preferred_element_type=jnp.float32) + bc_ref[...]
            else:
                acc = jnp.dot(wc_ref[0], tap(0),
                              preferred_element_type=jnp.float32)
                for k in range(1, K):
                    acc = acc + jnp.dot(wc_ref[k], tap(k),
                                        preferred_element_type=jnp.float32)
                y = acc + bc_ref[...]

            if write_halo:                       # carry for the next T tile
                prev_ref[...] = h_cd[:, t_tile - halo_w:]
            return y

        h1 = gelu(x) * scale1 + shift1
        y1 = causal_conv(h1, prev1_ref, wc1_ref, bc1_ref)
        h2 = gelu(y1) * scale2 + shift2
        y2 = causal_conv(h2, prev2_ref, wc2_ref, bc2_ref)

        out_ref[0] = (y2 + x).astype(out_ref.dtype)

    return kernel


def filter_resblock_pallas(x, c, params, K=5, dilation=1, t_tile=None,
                           compute_dtype=jnp.bfloat16, approx_gelu=True):
    (ws1, bs1, wh1, bh1, wc1, bc1,
     ws2, bs2, wh2, bh2, wc2, bc2) = params
    B, C, T = x.shape
    _, Ccond, Tc = c.shape
    assert C % 8 == 0, "channels must be a multiple of 8 (sublane tiling)"

    pad = (K - 1) * dilation
    halo_w = max(128, _round_up(max(pad, 1), 128))
    cd = jnp.dtype(compute_dtype)
    f32 = jnp.float32
    fuse_taps = C < 128          # fused (C, K*C) matmul only helps for small C

    # ---- VMEM-aware T tiling (v7x: 64 MiB/TC; v5e/v6e: 128 MiB) ----------
    try:
        vmem_cap = int(pltpu.get_tpu_info().vmem_capacity_bytes)
    except Exception:
        vmem_cap = 64 * 2 ** 20                  # conservative (v7x per-core)
    budget = max(24 * 2 ** 20, vmem_cap - 16 * 2 ** 20)

    if t_tile is None:
        t_tile = 1024 if vmem_cap >= 96 * 2 ** 20 else 512

    cd_sz = cd.itemsize
    x_sz = jnp.dtype(x.dtype).itemsize
    c_sz = jnp.dtype(c.dtype).itemsize

    def est_bytes(tt):
        blocks = 2 * (2 * C * tt * x_sz                       # x + out (2x buf)
                      + Ccond * Tc * c_sz
                      + Tc * tt * 4                           # interp tile
                      + 4 * C * Ccond * 4 + 4 * C * 4
                      + 2 * (K * C * C * cd_sz + C * 4))
        scratch = 4 * C * Tc * 4 + 2 * C * halo_w * cd_sz
        temps = (4 * C * tt * 4                               # mods
                 + 6 * C * tt * 4                             # activation chain
                 + 2 * C * (tt + halo_w) * cd_sz              # h_cat temporaries
                 + (K * C * tt * cd_sz if fuse_taps else 2 * C * tt * cd_sz))
        return blocks + scratch + temps

    tt = max(128, min(_round_up(t_tile, 128), _round_up(T, 128)))
    while tt > 128 and est_bytes(tt) > budget:
        tt -= 128
    t_tile_eff = tt
    t_pad = _round_up(T, t_tile_eff)
    n_t = t_pad // t_tile_eff
    if n_t > 1:
        assert t_tile_eff >= halo_w, \
            "T tile must be at least the causal halo width; raise t_tile"
    vmem_limit = int(min(budget, max(32 * 2 ** 20,
                                     int(est_bytes(t_tile_eff) * 1.5))))

    # Interp matrix (Tc -> T linear upsample), zero-padded to t_pad columns,
    # streamed as (Tc, t_tile) slabs.
    # TODO(synk): for very large Tc exploit its banded structure (scalar-prefetch
    # a per-tile row offset) instead of streaming the full row extent.
    W = np.zeros((Tc, t_pad), np.float32)
    W[:, :T] = linear_interp_matrix(Tc, T)
    interp = jnp.asarray(W)

    x_p = x if t_pad == T else jnp.pad(x, ((0, 0), (0, 0), (0, t_pad - T)))

    # Stacked FiLM weights/biases ('+1' on the scale folded into the bias), f32.
    wfilm = jnp.concatenate([ws1, wh1, ws2, wh2], axis=0).astype(f32)      # (4C, Ccond)
    bfilm = jnp.concatenate([bs1 + 1.0, bh1, bs2 + 1.0, bh2], axis=0).astype(f32)

    # Conv weights: fused (C, K*C) layout for small C, (K, C, C) per-tap else.
    if fuse_taps:
        wc1_k = jnp.transpose(wc1, (1, 0, 2)).reshape(C, K * C).astype(cd)
        wc2_k = jnp.transpose(wc2, (1, 0, 2)).reshape(C, K * C).astype(cd)
        wc_shape = (C, K * C)
    else:
        wc1_k = wc1.astype(cd)
        wc2_k = wc2.astype(cd)
        wc_shape = (K, C, C)
    bc1_f = bc1.astype(f32)
    bc2_f = bc2.astype(f32)

    kernel = _make_kernel(C, K, dilation, t_tile_eff, halo_w, cd,
                          fuse_taps, n_t > 1, approx_gelu)

    def fixed(shape):
        zeros = (0,) * len(shape)
        return pl.BlockSpec(shape, lambda b, t, _z=zeros: _z)

    in_specs = [
        pl.BlockSpec((1, C, t_tile_eff), lambda b, t: (b, 0, t)),   # x
        pl.BlockSpec((1, Ccond, Tc), lambda b, t: (b, 0, 0)),       # c
        pl.BlockSpec((Tc, t_tile_eff), lambda b, t: (0, t)),        # interp tile
        fixed((4 * C, Ccond)), fixed((4 * C, 1)),                   # stacked FiLM
        fixed(wc_shape), fixed((C, 1)),                             # conv 1
        fixed(wc_shape), fixed((C, 1)),                             # conv 2
    ]

    out = pl.pallas_call(
        kernel,
        out_shape=jax.ShapeDtypeStruct((B, C, t_pad), x.dtype),
        grid_spec=pltpu.PrefetchScalarGridSpec(
            num_scalar_prefetch=0,
            grid=(B, n_t),
            in_specs=in_specs,
            out_specs=pl.BlockSpec((1, C, t_tile_eff), lambda b, t: (b, 0, t)),
            scratch_shapes=[
                pltpu.VMEM((4 * C, Tc), f32),      # hoisted FiLM projection fc
                pltpu.VMEM((C, halo_w), cd),       # causal halo, conv 1
                pltpu.VMEM((C, halo_w), cd),       # causal halo, conv 2
            ]),
        # TODO(synk): on v7x with B==1, recompute the halo from an overlapped x
        # block so the T axis can be marked "parallel" (second TensorCore).
        compiler_params=pltpu.CompilerParams(
            dimension_semantics=("parallel", "arbitrary"),
            vmem_limit_bytes=vmem_limit),
    )(x_p, c, interp, wfilm, bfilm, wc1_k, bc1_f, wc2_k, bc2_f)

    return out[:, :, :T] if t_pad != T else out


# ----------------------------- pure-JAX reference -----------------------------

def filter_resblock_ref(x, c, params, K=5, dilation=1):
    B, C, T = x.shape
    _, Ccond, Tc = c.shape
    interp = jnp.asarray(linear_interp_matrix(Tc, T))
    pad = (K - 1) * dilation
    (ws1, bs1, wh1, bh1, wc1, bc1,
     ws2, bs2, wh2, bh2, wc2, bc2) = params

    def modconv(h, ws, bs, wh, bh, wc, bc):
        scale = jnp.einsum('oi,bit->bot', ws, c) + bs[None] + 1.0
        shift = jnp.einsum('oi,bit->bot', wh, c) + bh[None]
        scale = jnp.einsum('bct,ts->bcs', scale, interp)
        shift = jnp.einsum('bct,ts->bcs', shift, interp)
        h = h * scale + shift
        hp = jnp.pad(h, ((0, 0), (0, 0), (pad, 0)))
        y = jnp.broadcast_to(bc[None], (B, C, T))
        for k in range(K):
            y = y + jnp.einsum('oi,bit->bot', wc[k],
                               hp[:, :, k * dilation:k * dilation + T])
        return y

    res = x
    h = _gelu_exact(x)
    h = modconv(h, ws1, bs1, wh1, bh1, wc1, bc1)
    h = _gelu_exact(h)
    h = modconv(h, ws2, bs2, wh2, bh2, wc2, bc2)
    return h + res


# ----------------------------- main -----------------------------

if __name__ == "__main__":
    def run_case(B, C, Ccond, T, Tc, K, dilation, t_tile, compute_dtype,
                 approx_gelu, tol):
        key = jax.random.PRNGKey(0)
        keys = jax.random.split(key, 16)

        def w(k, shape, s=0.1):
            return jax.random.normal(k, shape, jnp.float32) * s

        # params in argument order (two ModulatedCausalConv1d blocks,
        # weight-norm folded into the conv weights)
        params = [
            w(keys[0], (C, Ccond)), w(keys[1], (C, 1)),      # to_scale 1
            w(keys[2], (C, Ccond)), w(keys[3], (C, 1)),      # to_shift 1
            w(keys[4], (K, C, C)),  w(keys[5], (C, 1)),      # causal conv 1
            w(keys[6], (C, Ccond)), w(keys[7], (C, 1)),      # to_scale 2
            w(keys[8], (C, Ccond)), w(keys[9], (C, 1)),      # to_shift 2
            w(keys[10], (K, C, C)), w(keys[11], (C, 1)),     # causal conv 2
        ]
        x = jax.random.normal(keys[12], (B, C, T), jnp.float32)
        c = jax.random.normal(keys[13], (B, Ccond, Tc), jnp.float32)

        out = jax.block_until_ready(
            filter_resblock_pallas(x, c, params, K=K, dilation=dilation,
                                   t_tile=t_tile, compute_dtype=compute_dtype,
                                   approx_gelu=approx_gelu))
        ref = jax.block_until_ready(
            filter_resblock_ref(x, c, params, K=K, dilation=dilation))
        np.testing.assert_allclose(np.asarray(out), np.asarray(ref),
                                   atol=tol, rtol=tol)

    # f32, exact GELU, multi T-tile (exercises the causal halo carry)
    run_case(B=2, C=16, Ccond=8, T=384, Tc=32, K=5, dilation=1,
             t_tile=128, compute_dtype=jnp.float32, approx_gelu=False, tol=1e-3)
    # f32, tanh GELU, ragged T (lane padding path) + dilation > 1
    run_case(B=2, C=8, Ccond=4, T=200, Tc=16, K=5, dilation=2,
             t_tile=128, compute_dtype=jnp.float32, approx_gelu=True, tol=2e-2)
    # per-tap conv path (C >= 128), f32
    run_case(B=1, C=128, Ccond=16, T=256, Tc=32, K=5, dilation=1,
             t_tile=128, compute_dtype=jnp.float32, approx_gelu=False, tol=5e-2)
    # bf16 MXU operands for the conv taps/weights only (FiLM stays f32)
    run_case(B=2, C=16, Ccond=8, T=256, Tc=32, K=5, dilation=1,
             t_tile=128, compute_dtype=jnp.bfloat16, approx_gelu=True, tol=1e-1)

    print("KERNEL_OK")
</pallas_src>

<mosaic_0001>
module attributes {stable_mosaic.version = 11 : i64} {
  func.func @kernel(%arg0: i32, %arg1: i32, %arg2: memref<1x16x128xf32, #tpu.memory_space<vmem>>, %arg3: memref<1x8x32xf32, #tpu.memory_space<vmem>>, %arg4: memref<32x128xf32, #tpu.memory_space<vmem>>, %arg5: memref<64x8xf32, #tpu.memory_space<vmem>>, %arg6: memref<64x1xf32, #tpu.memory_space<vmem>>, %arg7: memref<16x80xf32, #tpu.memory_space<vmem>>, %arg8: memref<16x1xf32, #tpu.memory_space<vmem>>, %arg9: memref<16x80xf32, #tpu.memory_space<vmem>>, %arg10: memref<16x1xf32, #tpu.memory_space<vmem>>, %arg11: memref<1x16x128xf32, #tpu.memory_space<vmem>>, %arg12: memref<64x32xf32, #tpu.memory_space<vmem>>, %arg13: memref<16x128xf32, #tpu.memory_space<vmem>>, %arg14: memref<16x128xf32, #tpu.memory_space<vmem>>) attributes {dimension_semantics = [#tpu.dimension_semantics<parallel>, #tpu.dimension_semantics<arbitrary>], iteration_bounds = array<i64: 2, 3>, scalar_prefetch = 0 : i64, scratch_operands = 3 : i64, tpu.core_type = #tpu.core_type<tc>, window_params = [{transform_indices = @transform_0, window_bounds = array<i64: 1, 16, 128>}, {transform_indices = @transform_1, window_bounds = array<i64: 1, 8, 32>}, {transform_indices = @transform_2, window_bounds = array<i64: 32, 128>}, {pipeline_mode = #tpu.pipeline_mode<synchronous>, transform_indices = @transform_3, window_bounds = array<i64: 64, 8>}, {pipeline_mode = #tpu.pipeline_mode<synchronous>, transform_indices = @transform_4, window_bounds = array<i64: 64, 1>}, {pipeline_mode = #tpu.pipeline_mode<synchronous>, transform_indices = @transform_5, window_bounds = array<i64: 16, 80>}, {pipeline_mode = #tpu.pipeline_mode<synchronous>, transform_indices = @transform_6, window_bounds = array<i64: 16, 1>}, {pipeline_mode = #tpu.pipeline_mode<synchronous>, transform_indices = @transform_7, window_bounds = array<i64: 16, 80>}, {pipeline_mode = #tpu.pipeline_mode<synchronous>, transform_indices = @transform_8, window_bounds = array<i64: 16, 1>}, {transform_indices = @transform_9, window_bounds = array<i64: 1, 16, 128>}]} {
    %c0_i32 = arith.constant 0 : i32
    %0 = arith.cmpi eq, %arg1, %c0_i32 : i32
    %1 = arith.extui %0 : i1 to i32
    %c0_i32_0 = arith.constant 0 : i32
    %2 = arith.cmpi ne, %1, %c0_i32_0 : i32
    scf.if %2 {
      %c0_40 = arith.constant 0 : index
      %c0_41 = arith.constant 0 : index
      %73 = vector.load %arg5[%c0_40, %c0_41] : memref<64x8xf32, #tpu.memory_space<vmem>>, vector<64x8xf32>
      %c0_42 = arith.constant 0 : index
      %c0_43 = arith.constant 0 : index
      %c0_44 = arith.constant 0 : index
      %74 = vector.load %arg3[%c0_42, %c0_43, %c0_44] : memref<1x8x32xf32, #tpu.memory_space<vmem>>, vector<1x8x32xf32>
      %75 = vector.shape_cast %74 : vector<1x8x32xf32> to vector<8x32xf32>
      %cst_45 = arith.constant dense<0.000000e+00> : vector<64x32xf32>
      %76 = tpu.matmul %73, %75, %cst_45 {dimension_numbers = #tpu.dot_dimension_numbers<[1], [0], [0], [1], [0, 0, 1, 1], [], []>} : vector<64x8xf32>, vector<8x32xf32>, vector<64x32xf32> -> vector<64x32xf32>
      %c0_46 = arith.constant 0 : index
      %c0_47 = arith.constant 0 : index
      %77 = vector.load %arg12[%c0_46, %c0_47] : memref<64x32xf32, #tpu.memory_space<vmem>>, vector<64x32xf32>
      tpu.vector_store %arg12[%c0_46, %c0_47], %76 {strides = array<i32>} : memref<64x32xf32, #tpu.memory_space<vmem>>, vector<64x32xf32>,
      %cst_48 = arith.constant 0.000000e+00 : f32
      %78 = vector.broadcast %cst_48 : f32 to vector<16x128xf32>
      %c0_49 = arith.constant 0 : index
      %c0_50 = arith.constant 0 : index
      %79 = vector.load %arg13[%c0_49, %c0_50] : memref<16x128xf32, #tpu.memory_space<vmem>>, vector<16x128xf32>
      tpu.vector_store %arg13[%c0_49, %c0_50], %78 {strides = array<i32>} : memref<16x128xf32, #tpu.memory_space<vmem>>, vector<16x128xf32>,
      %cst_51 = arith.constant 0.000000e+00 : f32
      %80 = vector.broadcast %cst_51 : f32 to vector<16x128xf32>
      %c0_52 = arith.constant 0 : index
      %c0_53 = arith.constant 0 : index
      %81 = vector.load %arg14[%c0_52, %c0_53] : memref<16x128xf32, #tpu.memory_space<vmem>>, vector<16x128xf32>
      tpu.vector_store %arg14[%c0_52, %c0_53], %80 {strides = array<i32>} : memref<16x128xf32, #tpu.memory_space<vmem>>, vector<16x128xf32>,
    } else {
    }
    %c0 = arith.constant 0 : index
    %c0_1 = arith.constant 0 : index
    %c0_2 = arith.constant 0 : index
    %3 = vector.load %arg2[%c0, %c0_1, %c0_2] : memref<1x16x128xf32, #tpu.memory_space<vmem>>, vector<1x16x128xf32>
    %4 = vector.shape_cast %3 : vector<1x16x128xf32> to vector<16x128xf32>
    %c0_3 = arith.constant 0 : index
    %c0_4 = arith.constant 0 : index
    %5 = vector.load %arg12[%c0_3, %c0_4] : memref<64x32xf32, #tpu.memory_space<vmem>>, vector<64x32xf32>
    %c0_5 = arith.constant 0 : index
    %c0_6 = arith.constant 0 : index
    %6 = vector.load %arg4[%c0_5, %c0_6] : memref<32x128xf32, #tpu.memory_space<vmem>>, vector<32x128xf32>
    %cst = arith.constant dense<0.000000e+00> : vector<64x128xf32>
    %7 = tpu.matmul %5, %6, %cst {dimension_numbers = #tpu.dot_dimension_numbers<[1], [0], [0], [1], [0, 0, 1, 1], [], []>} : vector<64x32xf32>, vector<32x128xf32>, vector<64x128xf32> -> vector<64x128xf32>
    %c0_7 = arith.constant 0 : index
    %c0_8 = arith.constant 0 : index
    %8 = vector.load %arg6[%c0_7, %c0_8] : memref<64x1xf32, #tpu.memory_space<vmem>>, vector<64x1xf32>
    %9 = vector.broadcast %8 : vector<64x1xf32> to vector<64x128xf32>
    %10 = arith.addf %7, %9 : vector<64x128xf32>
    %11 = vector.extract_strided_slice %10 {offsets = [0, 0], sizes = [16, 128], strides = [1, 1]} : vector<64x128xf32> to vector<16x128xf32>
    %12 = vector.extract_strided_slice %10 {offsets = [16, 0], sizes = [16, 128], strides = [1, 1]} : vector<64x128xf32> to vector<16x128xf32>
    %13 = vector.extract_strided_slice %10 {offsets = [32, 0], sizes = [16, 128], strides = [1, 1]} : vector<64x128xf32> to vector<16x128xf32>
    %14 = vector.extract_strided_slice %10 {offsets = [48, 0], sizes = [16, 128], strides = [1, 1]} : vector<64x128xf32> to vector<16x128xf32>
    %cst_9 = arith.constant 5.000000e-01 : f32
    %15 = vector.broadcast %cst_9 : f32 to vector<16x128xf32>
    %16 = arith.mulf %15, %4 : vector<16x128xf32>
    %cst_10 = arith.constant 0.707106769 : f32
    %17 = vector.broadcast %cst_10 : f32 to vector<16x128xf32>
    %18 = arith.mulf %4, %17 : vector<16x128xf32>
    %19 = math.erf %18 : vector<16x128xf32>
    %cst_11 = arith.constant 1.000000e+00 : f32
    %20 = vector.broadcast %cst_11 : f32 to vector<16x128xf32>
    %21 = arith.addf %20, %19 : vector<16x128xf32>
    %22 = arith.mulf %16, %21 : vector<16x128xf32>
    %23 = arith.mulf %22, %11 : vector<16x128xf32>
    %24 = arith.addf %23, %12 : vector<16x128xf32>
    %c0_12 = arith.constant 0 : index
    %c0_13 = arith.constant 0 : index
    %25 = vector.load %arg13[%c0_12, %c0_13] : memref<16x128xf32, #tpu.memory_space<vmem>>, vector<16x128xf32>
    %26 = tpu.concatenate %25, %24 in 1 : vector<16x128xf32>, vector<16x128xf32> -> vector<16x256xf32>
    %c132_i32 = arith.constant 132 : i32
    %27 = tpu.dynamic_rotate %26 by %c132_i32 dim 1 : vector<16x256xf32>, i32 -> vector<16x256xf32>
    %28 = vector.extract_strided_slice %27 {offsets = [0, 0], sizes = [16, 128], strides = [1, 1]} : vector<16x256xf32> to vector<16x128xf32>
    %c131_i32 = arith.constant 131 : i32
    %29 = tpu.dynamic_rotate %26 by %c131_i32 dim 1 : vector<16x256xf32>, i32 -> vector<16x256xf32>
    %30 = vector.extract_strided_slice %29 {offsets = [0, 0], sizes = [16, 128], strides = [1, 1]} : vector<16x256xf32> to vector<16x128xf32>
    %c130_i32 = arith.constant 130 : i32
    %31 = tpu.dynamic_rotate %26 by %c130_i32 dim 1 : vector<16x256xf32>, i32 -> vector<16x256xf32>
    %32 = vector.extract_strided_slice %31 {offsets = [0, 0], sizes = [16, 128], strides = [1, 1]} : vector<16x256xf32> to vector<16x128xf32>
    %c129_i32 = arith.constant 129 : i32
    %33 = tpu.dynamic_rotate %26 by %c129_i32 dim 1 : vector<16x256xf32>, i32 -> vector<16x256xf32>
    %34 = vector.extract_strided_slice %33 {offsets = [0, 0], sizes = [16, 128], strides = [1, 1]} : vector<16x256xf32> to vector<16x128xf32>
    %35 = tpu.concatenate %28, %30, %32, %34, %24 in 0 : vector<16x128xf32>, vector<16x128xf32>, vector<16x128xf32>, vector<16x128xf32>, vector<16x128xf32> -> vector<80x128xf32>
    %c0_14 = arith.constant 0 : index
    %c0_15 = arith.constant 0 : index
    %36 = vector.load %arg7[%c0_14, %c0_15] : memref<16x80xf32, #tpu.memory_space<vmem>>, vector<16x80xf32>
    %cst_16 = arith.constant dense<0.000000e+00> : vector<16x128xf32>
    %37 = tpu.matmul %36, %35, %cst_16 {dimension_numbers = #tpu.dot_dimension_numbers<[1], [0], [0], [1], [0, 0, 1, 1], [], []>} : vector<16x80xf32>, vector<80x128xf32>, vector<16x128xf32> -> vector<16x128xf32>
    %c0_17 = arith.constant 0 : index
    %c0_18 = arith.constant 0 : index
    %38 = vector.load %arg8[%c0_17, %c0_18] : memref<16x1xf32, #tpu.memory_space<vmem>>, vector<16x1xf32>
    %39 = vector.broadcast %38 : vector<16x1xf32> to vector<16x128xf32>
    %40 = arith.addf %37, %39 : vector<16x128xf32>
    %c0_19 = arith.constant 0 : index
    %c0_20 = arith.constant 0 : index
    %41 = vector.load %arg13[%c0_19, %c0_20] : memref<16x128xf32, #tpu.memory_space<vmem>>, vector<16x128xf32>
    tpu.vector_store %arg13[%c0_19, %c0_20], %24 {strides = array<i32>} : memref<16x128xf32, #tpu.memory_space<vmem>>, vector<16x128xf32>,
    %cst_21 = arith.constant 5.000000e-01 : f32
    %42 = vector.broadcast %cst_21 : f32 to vector<16x128xf32>
    %43 = arith.mulf %42, %40 : vector<16x128xf32>
    %cst_22 = arith.constant 0.707106769 : f32
    %44 = vector.broadcast %cst_22 : f32 to vector<16x128xf32>
    %45 = arith.mulf %40, %44 : vector<16x128xf32>
    %46 = math.erf %45 : vector<16x128xf32>
    %cst_23 = arith.constant 1.000000e+00 : f32
    %47 = vector.broadcast %cst_23 : f32 to vector<16x128xf32>
    %48 = arith.addf %47, %46 : vector<16x128xf32>
    %49 = arith.mulf %43, %48 : vector<16x128xf32>
    %50 = arith.mulf %49, %13 : vector<16x128xf32>
    %51 = arith.addf %50, %14 : vector<16x128xf32>
    %c0_24 = arith.constant 0 : index
    %c0_25 = arith.constant 0 : index
    %52 = vector.load %arg14[%c0_24, %c0_25] : memref<16x128xf32, #tpu.memory_space<vmem>>, vector<16x128xf32>
    %53 = tpu.concatenate %52, %51 in 1 : vector<16x128xf32>, vector<16x128xf32> -> vector<16x256xf32>
    %c132_i32_26 = arith.constant 132 : i32
    %54 = tpu.dynamic_rotate %53 by %c132_i32_26 dim 1 : vector<16x256xf32>, i32 -> vector<16x256xf32>
    %55 = vector.extract_strided_slice %54 {offsets = [0, 0], sizes = [16, 128], strides = [1, 1]} : vector<16x256xf32> to vector<16x128xf32>
    %c131_i32_27 = arith.constant 131 : i32
    %56 = tpu.dynamic_rotate %53 by %c131_i32_27 dim 1 : vector<16x256xf32>, i32 -> vector<16x256xf32>
    %57 = vector.extract_strided_slice %56 {offsets = [0, 0], sizes = [16, 128], strides = [1, 1]} : vector<16x256xf32> to vector<16x128xf32>
    %c130_i32_28 = arith.constant 130 : i32
    %58 = tpu.dynamic_rotate %53 by %c130_i32_28 dim 1 : vector<16x256xf32>, i32 -> vector<16x256xf32>
    %59 = vector.extract_strided_slice %58 {offsets = [0, 0], sizes = [16, 128], strides = [1, 1]} : vector<16x256xf32> to vector<16x128xf32>
    %c129_i32_29 = arith.constant 129 : i32
    %60 = tpu.dynamic_rotate %53 by %c129_i32_29 dim 1 : vector<16x256xf32>, i32 -> vector<16x256xf32>
    %61 = vector.extract_strided_slice %60 {offsets = [0, 0], sizes = [16, 128], strides = [1, 1]} : vector<16x256xf32> to vector<16x128xf32>
    %62 = tpu.concatenate %55, %57, %59, %61, %51 in 0 : vector<16x128xf32>, vector<16x128xf32>, vector<16x128xf32>, vector<16x128xf32>, vector<16x128xf32> -> vector<80x128xf32>
    %c0_30 = arith.constant 0 : index
    %c0_31 = arith.constant 0 : index
    %63 = vector.load %arg9[%c0_30, %c0_31] : memref<16x80xf32, #tpu.memory_space<vmem>>, vector<16x80xf32>
    %cst_32 = arith.constant dense<0.000000e+00> : vector<16x128xf32>
    %64 = tpu.matmul %63, %62, %cst_32 {dimension_numbers = #tpu.dot_dimension_numbers<[1], [0], [0], [1], [0, 0, 1, 1], [], []>} : vector<16x80xf32>, vector<80x128xf32>, vector<16x128xf32> -> vector<16x128xf32>
    %c0_33 = arith.constant 0 : index
    %c0_34 = arith.constant 0 : index
    %65 = vector.load %arg10[%c0_33, %c0_34] : memref<16x1xf32, #tpu.memory_space<vmem>>, vector<16x1xf32>
    %66 = vector.broadcast %65 : vector<16x1xf32> to vector<16x128xf32>
    %67 = arith.addf %64, %66 : vector<16x128xf32>
    %c0_35 = arith.constant 0 : index
    %c0_36 = arith.constant 0 : index
    %68 = vector.load %arg14[%c0_35, %c0_36] : memref<16x128xf32, #tpu.memory_space<vmem>>, vector<16x128xf32>
    tpu.vector_store %arg14[%c0_35, %c0_36], %51 {strides = array<i32>} : memref<16x128xf32, #tpu.memory_space<vmem>>, vector<16x128xf32>,
    %69 = arith.addf %67, %4 : vector<16x128xf32>
    %c0_37 = arith.constant 0 : index
    %c0_38 = arith.constant 0 : index
    %c0_39 = arith.constant 0 : index
    %70 = vector.load %arg11[%c0_37, %c0_38, %c0_39] : memref<1x16x128xf32, #tpu.memory_space<vmem>>, vector<1x16x128xf32>
    %71 = vector.shape_cast %70 : vector<1x16x128xf32> to vector<16x128xf32>
    %72 = vector.shape_cast %69 : vector<16x128xf32> to vector<1x16x128xf32>
    tpu.vector_store %arg11[%c0_37, %c0_38, %c0_39], %72 {strides = array<i32>} : memref<1x16x128xf32, #tpu.memory_space<vmem>>, vector<1x16x128xf32>,
    return
  }
  func.func @transform_0(%arg0: i32, %arg1: i32) -> (i32, i32, i32) {
    %c0_i32 = arith.constant 0 : i32
    %c0_i32_0 = arith.constant 0 : i32
    return %arg0, %c0_i32, %arg1 : i32, i32, i32
  }
  func.func @transform_1(%arg0: i32, %arg1: i32) -> (i32, i32, i32) {
    %c0_i32 = arith.constant 0 : i32
    %c0_i32_0 = arith.constant 0 : i32
    %c0_i32_1 = arith.constant 0 : i32
    return %arg0, %c0_i32, %c0_i32_0 : i32, i32, i32
  }
  func.func @transform_2(%arg0: i32, %arg1: i32) -> (i32, i32) {
    %c0_i32 = arith.constant 0 : i32
    %c0_i32_0 = arith.constant 0 : i32
    return %c0_i32, %arg1 : i32, i32
  }
  func.func @transform_3(%arg0: i32, %arg1: i32) -> (i32, i32) {
    %c0_i32 = arith.constant 0 : i32
    %c0_i32_0 = arith.constant 0 : i32
    %c0_i32_1 = arith.constant 0 : i32
    return %c0_i32, %c0_i32_0 : i32, i32
  }
  func.func @transform_4(%arg0: i32, %arg1: i32) -> (i32, i32) {
    %c0_i32 = arith.constant 0 : i32
    %c0_i32_0 = arith.constant 0 : i32
    %c0_i32_1 = arith.constant 0 : i32
    return %c0_i32, %c0_i32_0 : i32, i32
  }
  func.func @transform_5(%arg0: i32, %arg1: i32) -> (i32, i32) {
    %c0_i32 = arith.constant 0 : i32
    %c0_i32_0 = arith.constant 0 : i32
    %c0_i32_1 = arith.constant 0 : i32
    return %c0_i32, %c0_i32_0 : i32, i32
  }
  func.func @transform_6(%arg0: i32, %arg1: i32) -> (i32, i32) {
    %c0_i32 = arith.constant 0 : i32
    %c0_i32_0 = arith.constant 0 : i32
    %c0_i32_1 = arith.constant 0 : i32
    return %c0_i32, %c0_i32_0 : i32, i32
  }
  func.func @transform_7(%arg0: i32, %arg1: i32) -> (i32, i32) {
    %c0_i32 = arith.constant 0 : i32
    %c0_i32_0 = arith.constant 0 : i32
    %c0_i32_1 = arith.constant 0 : i32
    return %c0_i32, %c0_i32_0 : i32, i32
  }
  func.func @transform_8(%arg0: i32, %arg1: i32) -> (i32, i32) {
    %c0_i32 = arith.constant 0 : i32
    %c0_i32_0 = arith.constant 0 : i32
    %c0_i32_1 = arith.constant 0 : i32
    return %c0_i32, %c0_i32_0 : i32, i32
  }
  func.func @transform_9(%arg0: i32, %arg1: i32) -> (i32, i32, i32) {
    %c0_i32 = arith.constant 0 : i32
    %c0_i32_0 = arith.constant 0 : i32
    return %arg0, %c0_i32, %arg1 : i32, i32, i32
  }
}

</mosaic_0001>

<bundles_post_ra>
// kernel: tpu_custom_call.1
= control target key start
LH: loop header
LB: loop body
LE: loop exit
PB: predicated region body
PF: predicated region fallthrough
CT: control target
= control target key end

     0   :  { %s2311_s0 = inlined_call_operand.vmem [shape: f32[2,16,384], index: 0, kind: input, shape index: {}]   ;;  %s2312_s1 = inlined_call_operand.vmem [shape: f32[2,8,32], index: 1, kind: input, shape index: {}]   ;;  %s2313_s2 = inlined_call_operand.hbm [shape: f32[32,384], index: 2, kind: input, shape index: {}]   ;;  %s2314_s3 = inlined_call_operand.vmem [shape: f32[64,8], index: 3, kind: input, shape index: {}]   ;;  %s2315_s4 = inlined_call_operand.vmem [shape: f32[64,1], index: 4, kind: input, shape index: {}]   ;;  %s2316_s5 = inlined_call_operand.vmem [shape: f32[16,80], index: 5, kind: input, shape index: {}]   ;;  %s2317_s6 = inlined_call_operand.vmem [shape: f32[16,1], index: 6, kind: input, shape index: {}]   ;;  %s2318_s7 = inlined_call_operand.vmem [shape: f32[16,80], index: 7, kind: input, shape index: {}]   ;;  %s2319_s8 = inlined_call_operand.vmem [shape: f32[16,1], index: 8, kind: input, shape index: {}]   ;;  %s2320_s9 = inlined_call_operand.hbm [shape: f32[2,16,384], index: 9, kind: output, shape index: {}]  }
   0x1   :  { %2330 = sst [smem:[#allocation19_spill]] %s2316_s5 }
   0x2   :  { %2331 = sst [smem:[#allocation20_spill]] %s2318_s7 }
   0x3   :  { %2332 = sst [smem:[#allocation21_spill]] %s2320_s9 }
   0x4   :  { %14 = vsyncpa [#allocation7], 0 }
   0x5   :  { %16 = vsyncpa [#allocation7 + $0x1], 0 }
   0x6   :  { %17 = vsyncpa [#allocation8], 0 }
   0x7   :  { %19 = vsyncpa [#allocation8 + $0x1], 0  ;;  %s1871_s30 = smov 0   ;;  %s1873_s10 = smov 0  }
   0x8   :  { %s1875_s11 = smov 0   ;;  %s1877_s12 = smov 0  }
   0x9   :  { %s1879_s13 = smov 0   ;;  %s1881_s14 = smov 0  }
   0xa   :  { %s1883_s15 = smov 0   ;;  %s1885_s16 = smov 0  }
   0xb   :  { %s1887_s17 = smov 0   ;;  %s1889_s18 = smov 0  }
   0xc   :  { %s1891_s19 = smov 0  }
   0xd LB: > { %2333 = sst [smem:[#allocation12_spill]] %s1785_s14  ;;  %s1241_s20 = sadd.s32 4294967295, %s1805_s19   ;;  %s1805_s19 = sphi %s1891_s19, %s25_s19   ;;  %s1801_s18 = sphi %s1889_s18, %s2356_s18   ;;  %s1797_s17 = sphi %s1887_s17, %s2363_s17   ;;  %s1793_s16 = sphi %s1885_s16, %s2354_s16   ;;  %s1789_s15 = sphi %s1883_s15, %s2362_s15   ;;  %s1785_s14 = sphi %s1881_s14, %s2353_s14   ;;  %s1781_s13 = sphi %s1879_s13, %s2361_s13   ;;  %s1777_s12 = sphi %s1877_s12, %s2360_s12   ;;  %s1773_s11 = sphi %s1875_s11, %s2359_s11   ;;  %s1769_s10 = sphi %s1873_s10, %s2358_s10   ;;  %s1765_s30 = sphi %s1871_s30, %s2357_s30  }
   0xe   : > { %2334 = sst [smem:[#allocation13_spill]] %s1801_s18  ;;  %s1242_s21 = sadd.s32 4294967294, %s1805_s19  }
   0xf   : > { %s34_s22 = sadd.s32 1, %s1797_s17  ;;  %s37_s23 = sadd.s32 1, %s1801_s18 }
  0x10   : > { %p35_p0 = scmp.ge.s32.totalorder %s34_s22, 3  ;;  %s46_s24 = sadd.s32 1, %s1785_s14 }
  0x11   : > { %p53_p1 = scmp.ne.s32.totalorder %s1785_s14, %s1781_s13  ;;  %p54_p2 = scmp.eq.s32.totalorder %s1805_s19, 0 }
  0x12   : > { %s2365_s22 = smov (%p35_p0, %s34_s22), 0  ;;  %s2367_s23 = smov (!%p35_p0, %s37_s23), %s1801_s18 }
  0x13   : > { %2335 = sst [smem:[#allocation14_spill]] %s2365_s22  ;;  %s42_s25 = ssub.s32 %s1797_s17, %s2365_s22 }
  0x14   : > { %p1942_p3 = por %p54_p2, %p53_p1  ;;  %p39_p4 = scmp.ge.s32.totalorder %s2367_s23, 2 }
  0x15   : > { %p96_p5 = scmp.eq.s32.totalorder %s42_s25, 0  ;;  %s98_s27 = sadd.s32 1, %s1777_s12 }
  0x16   : > { %p105_p6 = scmp.ne.s32.totalorder %s1777_s12, %s1773_s11  ;;  %s2369_s23 = smov (%p39_p4, %s2367_s23), 0 }
  0x17   : > { %2337 = sst [smem:[#allocation15_spill]] %s2369_s23  ;;  %s41_s29 = ssub.s32 %s1801_s18, %s2369_s23 }
  0x18   : > { %s1952_s28 = scalar_select %p96_p5, %s1777_s12, %s98_s27  }
  0x19   : > { %p1956_p7 = por %p105_p6, %p54_p2  ;;  %s43_s9 = sor.u32 %s42_s25, %s41_s29 }
  0x1a   : > { %2338 = sst [smem:[#allocation16_spill]] %s1952_s28  ;;  %p111_p8 = scmp.ne.s32.totalorder %s1773_s11, %s1769_s10 }
  0x1b   : > { %p44_p9 = scmp.eq.s32.totalorder %s43_s9, 0  ;;  %p112_p10 = scmp.eq.s32.totalorder %s1241_s20, 0 }
  0x1c   : > { %p263_p11 = scmp.eq.s32.totalorder %s1241_s20, 5  ;;  %p268_p12 = scmp.ne.s32.totalorder %s1781_s13, %s1765_s30 }
  0x1d   : > { %s1965_s7 = scalar_select %p44_p9, %s1785_s14, %s46_s24  }
  0x1e   : > { %p1967_p13 = por %p112_p10, %p111_p8  ;;  %p1974_p0 = por %p263_p11, %p53_p1 }
  0x1f   : > { %2340 = sst [smem:[#allocation17_spill]] %s1965_s7  ;;  %p269_p2 = scmp.eq.s32.totalorder %s1242_s21, 5 }
  0x20   : > { %s2342_s27 = scalar_select %p1974_p0, 1, 0 }
  0x21   : > { %p1978_p4 = por %p269_p2, %p268_p12  ;;  %p1244_p5 = scmp.ge.s32.totalorder %s1805_s19, 6 }
  0x23   : > { %s2343_s23 = scalar_select %p1978_p4, 1, 0 }
  0x24   : > { %303 = sbr.rel (%p1244_p5) target bundleno = 78 (0x4e), region = 40 }
  0x25   : > { %2344 = sst [smem:[#allocation18_spill]] %s2343_s23 }
  0x2b   : > { %306 = sbr.rel (!%p1942_p3) target bundleno = 51 (0x33), region = 44  ;;  %s308_s9 = sand.u32 (%p1942_p3), 1, %s1785_s14  }
  0x2c   : > { %s1454_s10 = smul.u32 (%p1942_p3), 6, %s1801_s18  ;;  %s1245_s20 = sshll.u32 (%p1942_p3), %s308_s9, 4 }
  0x2d   : > { %s310_s28 = scalar_lea.vmem (%p1942_p3), [#allocation5], %s1245_s20 }
  0x2e   : > { %s312_s24 = sadd.s32 (%p1942_p3), %s1797_s17, %s1454_s10 }
  0x2f   : > { %s1246_s25 = sshll.u32 (%p1942_p3), %s312_s24, 3 }
  0x30   : > { %s314_s7 = scalar_lea.vmem (%p1942_p3), %s2311_s0, %s1246_s25 }
  0x31   : > { %v344_v0 = vld [vmem:[%s314_s7] sm:$0xff] (%p1942_p3)  ;;  %v346_v1 = vld [vmem:[%s314_s7 + $0x18] sm:$0xff] (%p1942_p3) }
  0x32   : > { %345 = vst [vmem:[%s310_s28] sm:$0xff] %v344_v0  ;;  %347 = vst [vmem:[%s310_s28 + $0x8] sm:$0xff] %v346_v1 }
  0x33 PF: > { %s361_s26 = sand.u32 1, %s1777_s12   ;;  %s1248_s23 = sshll.u32 %s1797_s17, 7 }
  0x34   : > { %s1247_s14 = sshll.u32 %s361_s26, 5  ;;  %s1996_s10 = scalar_lea.hbm %s2313_s2, %s1248_s23 }
  0x35   : > { %s365_s7 = scalar_lea.vmem [#allocation6], %s1247_s14  ;;  %s2000_s28 = scalar_lea.sflag [#allocation7], %s361_s26 }
  0x36   : > { %s371_s20 = sshll.u32 %s365_s7, 4  ;;  %s1655_s24 = scalar_lea.hbm %s1996_s10, 512  ;;  %s1998_s20 = int_to_ptr.vmem [resolvable:$true] %s371_s20 }
  0x37   : > { %p1656_p1 = scmp.ne.s32.totalorder %s1996_s10, %s1655_s24  ;;  %s1659_s18 = scalar_lea.hbm %s2313_s2, 1536 }
  0x38   : > { %p1660_p8 = scmp.lt.u32.totalorder %s1996_s10, %s2313_s2  ;;  %p1661_p9 = scmp.lt.u32.totalorder %s1659_s18, %s1655_s24 }
  0x39   : > { %p1657_p3 = pnand %p1656_p1, %p1956_p7  ;;  %p1663_p11 = scmp.lt.u32.totalorder %s1655_s24, %s1996_s10 }
  0x3a   : > { %p1662_p10 = por %p1661_p9, %p1660_p8 }
  0x3b   : > { %p1658_p6 = pneg %p1657_p3 }
  0x3c   : > { %p1664_p12 = por %p1663_p11, %p1662_p10 }
  0x3e   : > { %p1665_p2 = pnand %p1664_p12, %p1658_p6 }
  0x40   : > { %1668 = shalt.err (!%p1665_p2)
}
  0x41   : > { %s1669_s14 = scalar_lea.vmem %s1998_s20, 512  ;;  %s1807_s26 = smov [#allocation6]  }
  0x42   : > { %p1670_p5 = scmp.ne.s32.totalorder %s1998_s20, %s1669_s14  ;;  %s1673_s9 = sshll.u32 %s1807_s26, 4  ;;  %s1674_s9 = int_to_ptr.vmem [resolvable:$false] %s1673_s9 }
  0x43   : > { %s1675_s7 = scalar_lea.vmem %s1674_s9, 1024  ;;  %p1676_p4 = scmp.lt.s32.totalorder %s1998_s20, %s1674_s9 }
  0x44   : > { %p1671_p1 = pnand %p1670_p5, %p1956_p7  ;;  %p1677_p0 = scmp.lt.s32.totalorder %s1675_s7, %s1669_s14 }
  0x46   : > { %p1672_p3 = pneg %p1671_p1  ;;  %p1678_p8 = por %p1677_p0, %p1676_p4 }
  0x48   : > { %p1679_p9 = pnand %p1678_p8, %p1672_p3 }
  0x4a   : > { %1682 = shalt.err (!%p1679_p9)
}
  0x4b   : > { %s1808_s24 = smov 384   ;;  %s1809_s25 = smov 128  }
  0x4c   : > { %s1810_s29 = smov 8  }
  0x4d   : > { %1456 = dma.hbm_to_vmem [thread:$0]  (%p1956_p7), %s1996_s10, 512, %s1998_s20, %s2000_s28, %s1808_s24, %s1809_s25, %s1810_s29  }
  0x4e PF: > { %p1249_p6 = scmp.ge.s32.totalorder %s1805_s19, 1  ;;  %p379_p10 = scmp.lt.s32.totalorder %s1805_s19, 7 }
  0x50   : > { %p380_p11 = pnand %p1249_p6, %p379_p10 }
  0x51   : > { %s386_s18 = sand.u32 (!%p380_p11), 1, %s1781_s13   ;;  %s392_s23 = sand.u32 (!%p380_p11), 1, %s1773_s11  }
  0x52   : > { %383 = sbr.rel (%p380_p11) target bundleno = 1302 (0x516), region = 90  ;;  %s2030_s21 = sshll.u32 (!%p380_p11), %s386_s18, 4 }
  0x53   : > { %s1251_s14 = sshll.u32 (!%p380_p11), %s392_s23, 5  ;;  %s388_s22 = scalar_lea.vmem (!%p380_p11), [#allocation5], %s2030_s21 }
  0x54   : > { %s393_s10 = scalar_lea.sflag (!%p380_p11), [#allocation7], %s392_s23  ;;  %s2033_s20 = scalar_lea.vmem (!%p380_p11), [#allocation6], %s1251_s14 }
  0x59   : > { %1756 = dma.done.wait (%p1967_p13), %s393_s10, 512  }
  0x5a   : > { %1758 = vsyncadd (%p1967_p13), %s393_s10, 4294966784  ;;  %p439_p7 = scmp.lt.s32.totalorder %s1793_s16, 1  ;;  %s2045_s25 = scalar_lea.vmem [#allocation9], %s2030_s21 }
  0x5b   : > { %p1254_p0 = scmp.ne.s32.totalorder %s1789_s15, 0 }
  0x5c   : > { %s440_s28 = scalar_select %p439_p7, %s1793_s16, 1 }
  0x5d   : > { %446 = sbr.rel (%p1254_p0) target bundleno = 317 (0x13d), region = 102  ;;  %v447_v3 = vld [vmem:[%s2314_s3] sm:$0xff] (!%p1254_p0)  ;;  %vm456_vm0 = vcmask (!%p1254_p0), 64512   ;;  %v448_v5 = vld [vmem:[%s2314_s3 + $0x8] sm:$0xff] (!%p1254_p0)  ;;  %v449_v7 = vld [vmem:[%s2314_s3 + $0x10] sm:$0xff] (!%p1254_p0)  ;;  %v1811_v11 = vmov (!%p1254_p0), 0.0  }
  0x5e   : > { %s1253_s26 = sshll.u32 %s440_s28, 3  ;;  %v451_v4 = vld [vmem:[%s2314_s3 + $0x20] sm:$0xff] (!%p1254_p0)  ;;  %v452_v6 = vld [vmem:[%s2314_s3 + $0x28] sm:$0xff] (!%p1254_p0)  ;;  %v453_v8 = vld [vmem:[%s2314_s3 + $0x30] sm:$0xff] (!%p1254_p0)  ;;  %1326 = vmatprep.mubr.msk.f32.mxu0 (!%p1254_p0), %vm456_vm0, %v447_v3  ;;  %595 = vst [vmem:[#allocation3] sm:$0xff] (!%p1254_p0), %v1811_v11  ;;  %vm586_vm1 = vcmask (!%p1254_p0), 261120  }
  0x5f   : > { %s442_s24 = scalar_lea.vmem %s2312_s1, %s1253_s26  ;;  %1332 = vmatprep.mubr.msk.f32.mxu1 (!%p1254_p0), %vm456_vm0, %v451_v4  ;;  %v450_v9 = vld [vmem:[%s2314_s3 + $0x18] sm:$0xff] (!%p1254_p0)  ;;  %596 = vst [vmem:[#allocation3 + $0x8] sm:$0xff] (!%p1254_p0), %v1811_v11  ;;  %597 = vst [vmem:[#allocation4] sm:$0xff] (!%p1254_p0), %v1811_v11 }
  0x60   : > { %v455_v2 = vld [vmem:[%s442_s24] sm:$0xff] (!%p1254_p0)  ;;  %v454_v10 = vld [vmem:[%s2314_s3 + $0x38] sm:$0xff] (!%p1254_p0)  ;;  %598 = vst [vmem:[#allocation4 + $0x8] sm:$0xff] (!%p1254_p0), %v1811_v11 }
  0x61   : > { %1324 = vmatprep.subr.mxu0 (!%p1254_p0), %v455_v2  ;;  %1452 = vmatprep.subr.mxu1 (!%p1254_p0), %v455_v2 }
  0x62   : > { %1325 = vmatpush3.msra.mxu0 (!%p1254_p0), %v455_v2  ;;  %1453 = vmatpush3.msra.mxu1 (!%p1254_p0), %v455_v2 }
  0x63   : > { %1327 = vmatmul.mubr.msk.f32.vlgmr.msra.gmra.mrb[0].mxu0 (!%p1254_p0), %vm456_vm0, %v448_v5  ;;  %1333 = vmatmul.mubr.msk.f32.vlgmr.msra.gmra.mrb[0].mxu1 (!%p1254_p0), %vm456_vm0, %v452_v6 }
  0x64   : > { %1329 = vmatprep.mubr.msk.f32.mxu0 %vm456_vm0, %v449_v7  ;;  %1335 = vmatprep.mubr.msk.f32.mxu1 %vm456_vm0, %v453_v8 }
  0x67   : > { %1330 = vmatmul.mubr.msk.f32.gmra.mrb[2].mxu0 %vm456_vm0, %v450_v9  ;;  %1336 = vmatmul.mubr.msk.f32.gmra.mrb[2].mxu1 %vm456_vm0, %v454_v10 }
 0x136   : > { %v1328_v12 = vpop.f32.mrb[0].mxu0  ;;  %v1334_v13 = vpop.f32.mrb[0].mxu1 }
 0x137   : > { %588 = vst.msk [vmem:[#allocation2 + $0x8] sm:$0xff] %vm586_vm1, %v1328_v12  ;;  %592 = vst.msk [vmem:[#allocation2 + $0x28] sm:$0xff] %vm586_vm1, %v1334_v13  ;;  %v547_v14 = vpop.f32.mrb[1].mxu0  ;;  %v567_v15 = vpop.f32.mrb[1].mxu1 }
 0x138   : > { %587 = vst.msk [vmem:[#allocation2] sm:$0xff] %vm586_vm1, %v547_v14  ;;  %591 = vst.msk [vmem:[#allocation2 + $0x20] sm:$0xff] %vm586_vm1, %v567_v15 }
 0x13a   : > { %v1331_v16 = vpop.f32.mrb[2].mxu0  ;;  %v1337_v17 = vpop.f32.mrb[2].mxu1 }
 0x13b   : > { %590 = vst.msk [vmem:[#allocation2 + $0x18] sm:$0xff] %vm586_vm1, %v1331_v16  ;;  %594 = vst.msk [vmem:[#allocation2 + $0x38] sm:$0xff] %vm586_vm1, %v1337_v17  ;;  %v557_v18 = vpop.f32.mrb[3].mxu0  ;;  %v577_v19 = vpop.f32.mrb[3].mxu1 }
 0x13c   : > { %589 = vst.msk [vmem:[#allocation2 + $0x10] sm:$0xff] %vm586_vm1, %v557_v18  ;;  %593 = vst.msk [vmem:[#allocation2 + $0x30] sm:$0xff] %vm586_vm1, %v577_v19 }
 0x13d PF: > { %v609_v20 = vld [vmem:[%s2033_s20] sm:$0xff]  ;;  %v610_v21 = vld [vmem:[%s2033_s20 + $0x8] sm:$0xff]  ;;  %v611_v22 = vld [vmem:[%s2033_s20 + $0x10] sm:$0xff]  ;;  %vm661_vm2 = vcmask 261120   ;;  %v1812_v26 = vmov 0   ;;  %s1813_s14 = smov 4  }
 0x13e   : > { %v1404_v23 = vpack.c.bf16 %v610_v21, %v609_v20  ;;  %v612_v24 = vld [vmem:[%s2033_s20 + $0x18] sm:$0xff]  ;;  %1565 = vset.pattern.permute.xlu0 %v1812_v26  ;;  %1566 = vset.pattern.permute.xlu1 %v1812_v26  ;;  %v613_v28 = vld [vmem:[%s2315_s4] sm:$0xff]  ;;  %v614_v29 = vld [vmem:[%s2315_s4 + $0x8] sm:$0xff]  ;;  %s1814_s10 = smov 3   ;;  %s1815_s28 = smov 2   ;;  %vm867_vm3 = vcmask 654336  }
 0x13f   : > { %v601_v25 = vld [vmem:[#allocation2] sm:$0xff]  ;;  %v1408_v27 = vpack.c.bf16 %v612_v24, %v611_v22  ;;  %623 = vperm.xlu0 %1565, %v613_v28   ;;  %v806_v31 = vld [vmem:[#allocation3 + $0x8] sm:$0xff]  ;;  %v615_v32 = vld [vmem:[%s2315_s4 + $0x10] sm:$0xff]  ;;  %s1816_s26 = smov 1   ;;  %s2345_s7 = sld [smem:[#allocation19_spill]]  ;;  %v815_v24 = vlaneseq }
 0x140   : > { %1346 = vmatprep.mubr.msk.f32.mxu0 %vm661_vm2, %v601_v25  ;;  %1405 = vmatprep.subr.bf16.mxu0 %v1404_v23  ;;  %v805_v30 = vld [vmem:[#allocation3] sm:$0xff]  ;;  %v602_v33 = vld [vmem:[#allocation2 + $0x8] sm:$0xff]  ;;  %v616_v36 = vld [vmem:[%s2315_s4 + $0x18] sm:$0xff]  ;;  %s2346_s29 = sld [smem:[#allocation20_spill]]  ;;  %s1123_s21 = sshll.u32 %s2045_s25, 4  ;;  %s2243_s21 = int_to_ptr.vmem [resolvable:$true] %s1123_s21 }
 0x141   : > { %1407 = vmatpush3.bf16.msra.mxu0 %v1404_v23  ;;  %633 = vperm.xlu1 %1566, %v615_v32   ;;  %v1567_v35 = vpack.i.bf16 %v806_v31, %v805_v30  ;;  %v605_v38 = vld [vmem:[#allocation2 + $0x20] sm:$0xff]  ;;  %v606_v39 = vld [vmem:[#allocation2 + $0x28] sm:$0xff]  ;;  %v619_v44 = vld [vmem:[%s2315_s4 + $0x30] sm:$0xff]  ;;  %v2171_v25 = vand.u32 127, %v815_v24  ;;  %s2347_s20 = sld [smem:[#allocation21_spill]]  ;;  %p2348_p4 = scmp.ne.s32.totalorder %s2342_s27, 0 }
 0x142   : > { %1409 = vmatprep.subr.bf16.mxu0 %v1408_v27  ;;  %v604_v37 = vld [vmem:[#allocation2 + $0x18] sm:$0xff]  ;;  %v855_v42 = vld [vmem:[%s2317_s6] sm:$0xff]  ;;  %v965_v45 = vld [vmem:[#allocation4] sm:$0xff]  ;;  %s1817_s5 = smov [#allocation9]  }
 0x143   : > { %v603_v34 = vld [vmem:[#allocation2 + $0x10] sm:$0xff]  ;;  %628 = vperm.xlu0 %1565, %v614_v29   ;;  %v608_v41 = vld [vmem:[#allocation2 + $0x38] sm:$0xff]  ;;  %v617_v43 = vld [vmem:[%s2315_s4 + $0x20] sm:$0xff]  ;;  %vm817_vm4 = vcmp.lt.s32.totalorder %v2171_v25, 4  ;;  %vm828_vm5 = vcmp.lt.s32.totalorder %v2171_v25, 3  ;;  %vm839_vm6 = vcmp.lt.s32.totalorder %v2171_v25, 2 }
 0x144   : > { %v607_v40 = vld [vmem:[#allocation2 + $0x30] sm:$0xff]  ;;  %v966_v46 = vld [vmem:[#allocation4 + $0x8] sm:$0xff]  ;;  %v1009_v48 = vld [vmem:[%s2319_s8] sm:$0xff]  ;;  %vm850_vm7 = vcmp.lt.s32.totalorder %v2171_v25, 1 }
 0x145   : > { %1411 = vmatpush3.bf16.msra.mxu0 %v1408_v27  ;;  %638 = vperm.xlu1 %1566, %v616_v36   ;;  %v1607_v47 = vpack.i.bf16 %v966_v46, %v965_v45  ;;  %v2134_v49 = vld [vmem:[%s388_s22 + $0x8] sm:$0xff]  ;;  %v2138_v50 = vld [vmem:[%s388_s22] sm:$0xff] }
 0x146   : > { %v794_v51 = vmul.f32 0.70710677, %v2134_v49  ;;  %v793_v52 = vmul.f32 0.70710677, %v2138_v50  ;;  %v792_v56 = vmul.f32 0.5, %v2134_v49  ;;  %v791_v59 = vmul.f32 0.5, %v2138_v50 }
 0x147   : > { %1568 = vrot.lane.b32.xlu0 %v1567_v35, %s1813_s14  ;;  %v853_v19 = vld [vmem:[%s2345_s7] sm:$0xff]  ;;  %v856_v20 = vld [vmem:[%s2317_s6 + $0x8] sm:$0xff]  ;;  %v620_v22 = vld [vmem:[%s2315_s4 + $0x38] sm:$0xff] }
 0x148   : > { %1347 = vmatmul.mubr.msk.f32.vlgmr.msra.gmra.mrb[0].mxu0 %vm661_vm2, %v602_v33  ;;  %1647 = verf.f32 %v794_v51  ;;  %1378 = vmatprep.mubr.msk.f32.mxu1 %vm867_vm3, %v853_v19  ;;  %v618_v21 = vld [vmem:[%s2315_s4 + $0x28] sm:$0xff] }
 0x149   : > { %1349 = vmatprep.mubr.msk.f32.mxu0 %vm661_vm2, %v603_v34  ;;  %1649 = verf.f32 %v793_v52 }
 0x14b   : > { %1573 = vrot.lane.b32.xlu0 %v1567_v35, %s1814_s10 }
 0x14c   : > { %1350 = vmatmul.mubr.msk.f32.gmra.mrb[2].mxu0 %vm661_vm2, %v604_v37 }
 0x14d   : > { %1352 = vmatprep.mubr.msk.f32.mxu0 %vm661_vm2, %v605_v38 }
 0x14f   : > { %1578 = vrot.lane.b32.xlu0 %v1567_v35, %s1815_s28 }
 0x150   : > { %1353 = vmatmul.mubr.msk.f32.gmra.mrb[4].mxu0 %vm661_vm2, %v606_v39 }
 0x151   : > { %1355 = vmatprep.mubr.msk.f32.mxu0 %vm661_vm2, %v607_v40 }
 0x152   : > { %v1648_v53 = vpop.eup %1647 }
 0x153   : > { %1583 = vrot.lane.b32.xlu0 %v1567_v35, %s1816_s26  ;;  %v1650_v55 = vpop.eup %1649  ;;  %v798_v57 = vadd.f32 1.0, %v1648_v53 }
 0x154   : > { %1356 = vmatmul.mubr.msk.f32.gmra.mrb[6].mxu0 %vm661_vm2, %v608_v41  ;;  %v797_v60 = vadd.f32 1.0, %v1650_v55 }
 0x155   : > { %v800_v0 = vmul.f32 %v798_v57, %v792_v56 }
 0x156   : > { %v799_v3 = vmul.f32 %v797_v60, %v791_v59 }
 0x157   : > { %859 = vperm.xlu0 %1565, %v855_v42  }
 0x15b   : > { %643 = vperm.xlu0 %1565, %v617_v43  }
 0x15f   : > { %653 = vperm.xlu0 %1565, %v619_v44  }
 0x163   : > { %1608 = vrot.lane.b32.xlu0 %v1607_v47, %s1813_s14 }
 0x167   : > { %1613 = vrot.lane.b32.xlu0 %v1607_v47, %s1814_s10 }
 0x16b   : > { %1618 = vrot.lane.b32.xlu0 %v1607_v47, %s1815_s28 }
 0x16f   : > { %1623 = vrot.lane.b32.xlu0 %v1607_v47, %s1816_s26 }
 0x173   : > { %1013 = vperm.xlu0 %1565, %v1009_v48  }
 0x1be   : > { %v624_v54 = vpop.permute.xlu0 %623 }
 0x1c0   : > { %v634_v58 = vpop.permute.xlu1 %633 }
 0x1c2   : > { %v629_v61 = vpop.permute.xlu0 %628 }
 0x1c4   : > { %v639_v4 = vpop.permute.xlu1 %638 }
 0x1c6   : > { %v1569_v23 = vpop.permute.xlu0 %1568 }
 0x1c7   : > { %v1571_v27 = vunpack.i.h.bf16 %v1569_v23  ;;  %v1570_v28 = vunpack.i.l.bf16 %v1569_v23 }
 0x1ca   : > { %v1574_v26 = vpop.permute.xlu0 %1573 }
 0x1cb   : > { %v1576_v32 = vunpack.i.h.bf16 %v1574_v26  ;;  %v1575_v33 = vunpack.i.l.bf16 %v1574_v26 }
 0x1ce   : > { %v1579_v36 = vpop.permute.xlu0 %1578 }
 0x1cf   : > { %v1581_v41 = vunpack.i.h.bf16 %v1579_v36  ;;  %v1580_v42 = vunpack.i.l.bf16 %v1579_v36 }
 0x1d2   : > { %v1584_v51 = vpop.permute.xlu0 %1583 }
 0x1d3   : > { %v1586_v52 = vunpack.i.h.bf16 %v1584_v51  ;;  %v1585_v53 = vunpack.i.l.bf16 %v1584_v51 }
 0x21b   : > { %v1348_v62 = vpop.f32.mrb[0].mxu0 }
 0x21c   : > { %v758_v63 = vadd.f32 %v1348_v62, %v629_v61  ;;  %v752_v1 = vpop.f32.mrb[1].mxu0 }
 0x21d   : > { %v753_v2 = vadd.f32 %v752_v1, %v624_v54 }
 0x21e   : > { %v802_v6 = vmul.f32 %v800_v0, %v758_v63  ;;  %v854_v63 = vld [vmem:[%s2345_s7 + $0x8] sm:$0xff] }
 0x21f   : > { %v1351_v5 = vpop.f32.mrb[2].mxu0  ;;  %v801_v9 = vmul.f32 %v799_v3, %v753_v2  ;;  %v860_v2 = vpop.permute.xlu0 %859 }
 0x220   : > { %v768_v7 = vadd.f32 %v1351_v5, %v639_v4  ;;  %v762_v8 = vpop.f32.mrb[3].mxu0 }
 0x221   : > { %v763_v10 = vadd.f32 %v762_v8, %v634_v58 }
 0x222   : > { %v804_v11 = vadd.f32 %v802_v6, %v768_v7 }
 0x223   : > { %v803_v12 = vadd.f32 %v801_v9, %v763_v10  ;;  %v2144_v13 = vpop.f32.mrb[4].mxu0  ;;  %v644_v9 = vpop.permute.xlu0 %643 }
 0x224   : > { %950 = vst [vmem:[#allocation3 + $0x8] sm:$0xff] %v804_v11  ;;  %v2146_v14 = vpop.f32.mrb[5].mxu0 }
 0x225   : > { %949 = vst [vmem:[#allocation3] sm:$0xff] %v803_v12  ;;  %v1587_v15 = vpack.i.bf16 %v804_v11, %v803_v12  ;;  %v2148_v16 = vpack.c.bf16 %v804_v11, %v803_v12  ;;  %v773_v23 = vadd.f32 %v2146_v14, %v644_v9  ;;  %v1010_v14 = vld [vmem:[%s2319_s8 + $0x8] sm:$0xff] }
 0x227   : > { %v2150_v17 = vpop.f32.mrb[6].mxu0  ;;  %1588 = vrot.lane.b32.xlu1 %v1587_v15, %s1813_s14  ;;  %v654_v26 = vpop.permute.xlu0 %653 }
 0x228   : > { %v2153_v18 = vpop.f32.mrb[7].mxu0 }
 0x22b   : > { %1593 = vrot.lane.b32.xlu1 %v1587_v15, %s1814_s10 }
 0x22f   : > { %1598 = vrot.lane.b32.xlu1 %v1587_v15, %s1815_s28 }
 0x233   : > { %1603 = vrot.lane.b32.xlu1 %v1587_v15, %s1816_s26 }
 0x237   : > { %864 = vperm.xlu1 %1566, %v856_v20  }
 0x23b   : > { %648 = vperm.xlu1 %1566, %v618_v21  }
 0x23f   : > { %658 = vperm.xlu1 %1566, %v620_v22  }
 0x299   : > { %v1589_v29 = vpop.permute.xlu1 %1588 }
 0x29a   : > { %v1591_v30 = vunpack.i.h.bf16 %v1589_v29  ;;  %v1590_v31 = vunpack.i.l.bf16 %v1589_v29  ;;  %v783_v29 = vadd.f32 %v2153_v18, %v654_v26 }
 0x29c   : > { %v818_v34 = vsel %vm817_vm4, %v1570_v28, %v1590_v31  ;;  %v819_v35 = vsel %vm817_vm4, %v1571_v27, %v1591_v30 }
 0x29d   : > { %v1594_v37 = vpop.permute.xlu1 %1593  ;;  %v1412_v38 = vpack.c.bf16 %v819_v35, %v818_v34 }
 0x29e   : > { %v1596_v39 = vunpack.i.h.bf16 %v1594_v37  ;;  %v1595_v40 = vunpack.i.l.bf16 %v1594_v37 }
 0x29f   : > { %1413 = vmatprep.subr.bf16.mxu1 %v1412_v38 }
 0x2a0   : > { %1415 = vmatpush3.bf16.msra.mxu1 %v1412_v38  ;;  %v829_v43 = vsel %vm828_vm5, %v1575_v33, %v1595_v40  ;;  %v830_v44 = vsel %vm828_vm5, %v1576_v32, %v1596_v39 }
 0x2a1   : > { %v1599_v45 = vpop.permute.xlu1 %1598  ;;  %v1416_v46 = vpack.c.bf16 %v830_v44, %v829_v43 }
 0x2a2   : > { %v1601_v47 = vunpack.i.h.bf16 %v1599_v45  ;;  %v1600_v48 = vunpack.i.l.bf16 %v1599_v45 }
 0x2a3   : > { %1417 = vmatprep.subr.bf16.mxu1 %v1416_v46 }
 0x2a4   : > { %1419 = vmatpush3.bf16.msra.mxu1 %v1416_v46  ;;  %v840_v54 = vsel %vm839_vm6, %v1580_v42, %v1600_v48  ;;  %v841_v55 = vsel %vm839_vm6, %v1581_v41, %v1601_v47 }
 0x2a5   : > { %v1604_v56 = vpop.permute.xlu1 %1603  ;;  %v1420_v57 = vpack.c.bf16 %v841_v55, %v840_v54 }
 0x2a6   : > { %v1606_v58 = vunpack.i.h.bf16 %v1604_v56  ;;  %v1605_v59 = vunpack.i.l.bf16 %v1604_v56 }
 0x2a7   : > { %1421 = vmatprep.subr.bf16.mxu1 %v1420_v57 }
 0x2a8   : > { %1423 = vmatpush3.bf16.msra.mxu1 %v1420_v57  ;;  %v851_v60 = vsel %vm850_vm7, %v1585_v53, %v1605_v59  ;;  %v852_v61 = vsel %vm850_vm7, %v1586_v52, %v1606_v58 }
 0x2a9   : > { %v1424_v62 = vpack.c.bf16 %v852_v61, %v851_v60 }
 0x2ab   : > { %1425 = vmatprep.subr.bf16.mxu1 %v1424_v62 }
 0x2ac   : > { %1427 = vmatpush3.bf16.msra.mxu1 %v1424_v62 }
 0x2ad   : > { %1429 = vmatprep.subr.bf16.mxu1 %v2148_v16 }
 0x2b0   : > { %1431 = vmatpush3.bf16.msra.mxu1 %v2148_v16 }
 0x2b3   : > { %1379 = vmatmul.mubr.msk.f32.vlgmr.msra.gmra.mrb[0].mxu1 %vm867_vm3, %v854_v63 }
 0x2b6   : > { %v865_v0 = vpop.permute.xlu1 %864 }
 0x2ba   : > { %v649_v8 = vpop.permute.xlu1 %648 }
 0x2bb   : > { %v778_v21 = vadd.f32 %v2144_v13, %v649_v8  ;;  %v1007_v13 = vld [vmem:[%s2346_s29] sm:$0xff] }
 0x2bc   : > { %1401 = vmatprep.mubr.msk.f32.mxu0 %vm867_vm3, %v1007_v13 }
 0x2be   : > { %v659_v16 = vpop.permute.xlu1 %658 }
 0x2bf   : > { %v788_v27 = vadd.f32 %v2150_v17, %v659_v16  ;;  %v1609_v17 = vpop.permute.xlu0 %1608 }
 0x2c0   : > { %v1611_v35 = vunpack.i.h.bf16 %v1609_v17  ;;  %v1610_v36 = vunpack.i.l.bf16 %v1609_v17 }
 0x2c3   : > { %v1614_v18 = vpop.permute.xlu0 %1613 }
 0x2c4   : > { %v1616_v40 = vunpack.i.h.bf16 %v1614_v18  ;;  %v1615_v41 = vunpack.i.l.bf16 %v1614_v18 }
 0x2c7   : > { %v1619_v44 = vpop.permute.xlu0 %1618 }
 0x2c8   : > { %v1621_v51 = vunpack.i.h.bf16 %v1619_v44  ;;  %v1620_v52 = vunpack.i.l.bf16 %v1619_v44 }
 0x2cb   : > { %v1624_v59 = vpop.permute.xlu0 %1623 }
 0x2cc   : > { %v1626_v60 = vunpack.i.h.bf16 %v1624_v59  ;;  %v1625_v61 = vunpack.i.l.bf16 %v1624_v59 }
 0x2cf   : > { %v1014_v9 = vpop.permute.xlu0 %1013 }
 0x386   : > { %v1380_v1 = vpop.f32.mrb[0].mxu1 }
 0x387   : > { %v946_v3 = vadd.f32 %v1380_v1, %v865_v0  ;;  %v940_v4 = vpop.f32.mrb[1].mxu1 }
 0x388   : > { %v941_v5 = vadd.f32 %v940_v4, %v860_v2 }
 0x389   : > { %v954_v6 = vmul.f32 0.70710677, %v946_v3  ;;  %v952_v12 = vmul.f32 0.5, %v946_v3 }
 0x38a   : > { %v953_v7 = vmul.f32 0.70710677, %v941_v5  ;;  %v951_v19 = vmul.f32 0.5, %v941_v5 }
 0x38b   : > { %1651 = verf.f32 %v954_v6 }
 0x38c   : > { %1653 = verf.f32 %v953_v7  ;;  %v1008_v7 = vld [vmem:[%s2346_s29 + $0x8] sm:$0xff] }
 0x395   : > { %v1652_v10 = vpop.eup %1651 }
 0x396   : > { %v1654_v11 = vpop.eup %1653  ;;  %v958_v15 = vadd.f32 1.0, %v1652_v10 }
 0x397   : > { %v957_v20 = vadd.f32 1.0, %v1654_v11 }
 0x398   : > { %v960_v22 = vmul.f32 %v958_v15, %v952_v12 }
 0x399   : > { %v959_v24 = vmul.f32 %v957_v20, %v951_v19 }
 0x39a   : > { %v962_v28 = vmul.f32 %v960_v22, %v778_v21 }
 0x39b   : > { %v961_v30 = vmul.f32 %v959_v24, %v773_v23 }
 0x39c   : > { %v964_v31 = vadd.f32 %v962_v28, %v788_v27 }
 0x39d   : > { %v963_v32 = vadd.f32 %v961_v30, %v783_v29 }
 0x39e   : > { %1103 = vst [vmem:[#allocation4 + $0x8] sm:$0xff] %v964_v31 }
 0x39f   : > { %1102 = vst [vmem:[#allocation4] sm:$0xff] %v963_v32  ;;  %v1627_v33 = vpack.i.bf16 %v964_v31, %v963_v32  ;;  %v1448_v34 = vpack.c.bf16 %v964_v31, %v963_v32 }
 0x3a1   : > { %1628 = vrot.lane.b32.xlu1 %v1627_v33, %s1813_s14  ;;  %s1687_s14 = sshll.u32 %s1817_s5, 4  ;;  %s1688_s14 = int_to_ptr.vmem [resolvable:$false] %s1687_s14 }
 0x3a2   : > { %p1690_p5 = scmp.lt.s32.totalorder %s2243_s21, %s1688_s14 }
 0x3a5   : > { %1633 = vrot.lane.b32.xlu1 %v1627_v33, %s1814_s10  ;;  %s1689_s10 = scalar_lea.vmem %s1688_s14, 512 }
 0x3a9   : > { %1638 = vrot.lane.b32.xlu1 %v1627_v33, %s1815_s28  ;;  %s1455_s28 = smul.u32 6, %s1793_s16  ;;  %s1683_s16 = scalar_lea.vmem %s2243_s21, 256 }
 0x3aa   : > { %p1684_p13 = scmp.ne.s32.totalorder %s2243_s21, %s1683_s16  ;;  %p1691_p1 = scmp.lt.s32.totalorder %s1689_s10, %s1683_s16 }
 0x3ac   : > { %p1685_p12 = pnand %p1684_p13, %p2348_p4  ;;  %p1692_p3 = por %p1691_p1, %p1690_p5 }
 0x3ad   : > { %1643 = vrot.lane.b32.xlu1 %v1627_v33, %s1816_s26  ;;  %s1120_s26 = sadd.s32 %s1789_s15, %s1455_s28  ;;  %s2250_s15 = scalar_lea.sflag [#allocation8], %s386_s18 }
 0x3ae   : > { %s1276_s9 = sshll.u32 %s1120_s26, 7  ;;  %p1686_p2 = pneg %p1685_p12 }
 0x3af   : > { %s2240_s23 = scalar_lea.hbm %s2347_s20, %s1276_s9 }
 0x3b0   : > { %p1693_p8 = pnand %p1692_p3, %p1686_p2 }
 0x3b1   : > { %1018 = vperm.xlu1 %1566, %v1010_v14  }
 0x413   : > { %v1629_v37 = vpop.permute.xlu1 %1628 }
 0x414   : > { %v1631_v38 = vunpack.i.h.bf16 %v1629_v37  ;;  %v1630_v39 = vunpack.i.l.bf16 %v1629_v37 }
 0x416   : > { %v975_v42 = vsel %vm817_vm4, %v1610_v36, %v1630_v39  ;;  %v976_v43 = vsel %vm817_vm4, %v1611_v35, %v1631_v38 }
 0x417   : > { %v1634_v45 = vpop.permute.xlu1 %1633  ;;  %v1432_v46 = vpack.c.bf16 %v976_v43, %v975_v42 }
 0x418   : > { %v1636_v47 = vunpack.i.h.bf16 %v1634_v45  ;;  %v1635_v48 = vunpack.i.l.bf16 %v1634_v45 }
 0x419   : > { %1433 = vmatprep.subr.bf16.mxu0 %v1432_v46 }
 0x41a   : > { %1435 = vmatpush3.bf16.msra.mxu0 %v1432_v46  ;;  %v985_v53 = vsel %vm828_vm5, %v1615_v41, %v1635_v48  ;;  %v986_v54 = vsel %vm828_vm5, %v1616_v40, %v1636_v47 }
 0x41b   : > { %v1639_v55 = vpop.permute.xlu1 %1638  ;;  %v1436_v56 = vpack.c.bf16 %v986_v54, %v985_v53 }
 0x41c   : > { %v1641_v57 = vunpack.i.h.bf16 %v1639_v55  ;;  %v1640_v58 = vunpack.i.l.bf16 %v1639_v55 }
 0x41d   : > { %1437 = vmatprep.subr.bf16.mxu0 %v1436_v56 }
 0x41e   : > { %1439 = vmatpush3.bf16.msra.mxu0 %v1436_v56  ;;  %v995_v62 = vsel %vm839_vm6, %v1620_v52, %v1640_v58  ;;  %v996_v63 = vsel %vm839_vm6, %v1621_v51, %v1641_v57 }
 0x41f   : > { %v1644_v0 = vpop.permute.xlu1 %1643  ;;  %v1440_v1 = vpack.c.bf16 %v996_v63, %v995_v62 }
 0x420   : > { %v1646_v2 = vunpack.i.h.bf16 %v1644_v0  ;;  %v1645_v3 = vunpack.i.l.bf16 %v1644_v0 }
 0x421   : > { %1441 = vmatprep.subr.bf16.mxu0 %v1440_v1 }
 0x422   : > { %1443 = vmatpush3.bf16.msra.mxu0 %v1440_v1  ;;  %v1005_v4 = vsel %vm850_vm7, %v1625_v61, %v1645_v3  ;;  %v1006_v5 = vsel %vm850_vm7, %v1626_v60, %v1646_v2 }
 0x423   : > { %v1444_v6 = vpack.c.bf16 %v1006_v5, %v1005_v4 }
 0x425   : > { %1445 = vmatprep.subr.bf16.mxu0 %v1444_v6 }
 0x426   : > { %1447 = vmatpush3.bf16.msra.mxu0 %v1444_v6 }
 0x427   : > { %1449 = vmatprep.subr.bf16.mxu0 %v1448_v34 }
 0x42a   : > { %1451 = vmatpush3.bf16.msra.mxu0 %v1448_v34 }
 0x42d   : > { %1402 = vmatmul.mubr.msk.f32.vlgmr.msra.gmra.mrb[8].mxu0 %vm867_vm3, %v1008_v7 }
 0x430   : > { %v1019_v8 = vpop.permute.xlu1 %1018 }
 0x500   : > { %v1403_v25 = vpop.f32.mrb[8].mxu0 }
 0x501   : > { %v1099_v10 = vadd.f32 %v1403_v25, %v1019_v8  ;;  %v1093_v11 = vpop.f32.mrb[9].mxu0 }
 0x502   : > { %v1094_v12 = vadd.f32 %v1093_v11, %v1014_v9 }
 0x503   : > { %v1105_v15 = vadd.f32 %v1099_v10, %v2134_v49 }
 0x504   : > { %v1104_v16 = vadd.f32 %v1094_v12, %v2138_v50 }
 0x505   : > { %1107 = vst [vmem:[%s2045_s25 + $0x8] sm:$0xff] %v1105_v15 }
 0x506   : > { %1106 = vst [vmem:[%s2045_s25] sm:$0xff] %v1104_v16 }
 0x507   : > { %1696 = shalt.err (!%p1693_p8)
}
 0x508   : > { %s1697_s18 = scalar_lea.hbm %s2240_s23, 256  ;;  %s1701_s26 = scalar_lea.hbm %s2347_s20, 1536 }
 0x509   : > { %p1698_p9 = scmp.ne.s32.totalorder %s2240_s23, %s1697_s18  ;;  %p1702_p11 = scmp.lt.u32.totalorder %s2240_s23, %s2347_s20 }
 0x50a   : > { %p1703_p7 = scmp.lt.u32.totalorder %s1701_s26, %s1697_s18  ;;  %p1705_p13 = scmp.lt.u32.totalorder %s1697_s18, %s2240_s23 }
 0x50b   : > { %p1699_p6 = pnand %p1698_p9, %p2348_p4 }
 0x50c   : > { %p1704_p0 = por %p1703_p7, %p1702_p11 }
 0x50d   : > { %p1700_p10 = pneg %p1699_p6 }
 0x50e   : > { %p1706_p12 = por %p1705_p13, %p1704_p0 }
 0x510   : > { %p1707_p2 = pnand %p1706_p12, %p1700_p10 }
 0x512   : > { %1710 = shalt.err (!%p1707_p2)
}
 0x513   : > { %s1818_s24 = smov 128   ;;  %s1819_s16 = smov 384  }
 0x514   : > { %s1820_s5 = smov 8  }
 0x515   : > { %1458 = dma.vmem_to_hbm [thread:$0]  (%p2348_p4), %s2243_s21, 256, %s2240_s23, %s2250_s15, %s1818_s24, %s1819_s16, %s1820_s5  }
 0x516 PF: > { %s2349_s14 = sld [smem:[#allocation18_spill]]  ;;  %p1464_p5 = scmp.ge.s32.totalorder %s1805_s19, 2 }
 0x517   : > { %s1138_s10 = sand.u32 1, %s1765_s30  }
 0x518   : > { %s1139_s18 = scalar_lea.sflag [#allocation8], %s1138_s10 }
 0x51c   : > { %p2350_p1 = scmp.ne.s32.totalorder %s2349_s14, 0 }
 0x51e   : > { %p1461_p3 = pnand %p1464_p5, %p2350_p1 }
 0x520   : > { %1760 = dma.done.wait (!%p1461_p3), %s1139_s18, 256  }
 0x521   : > { %1762 = vsyncadd (!%p1461_p3), %s1139_s18, 4294967040  ;;  %s25_s19 = sadd.s32 1, %s1805_s19   ;;  %s2351_s25 = sld [smem:[#allocation16_spill]] }
 0x522   : > { %p22_p8 = scmp.ge.s32.totalorder %s25_s19, 8   ;;  %s2352_s27 = sld [smem:[#allocation12_spill]] }
 0x523   : > { %s2353_s14 = sld [smem:[#allocation17_spill]]  ;;  %s2354_s16 = sld [smem:[#allocation13_spill]] }
 0x524   : > { %s2355_s21 = sld [smem:[#allocation14_spill]]  ;;  %s2356_s18 = sld [smem:[#allocation15_spill]] }
 0x525   : > { %s2357_s30 = smov %s1781_s13  ;;  %s2358_s10 = smov %s1773_s11 }
 0x526   : > { %s2359_s11 = smov %s1777_s12  ;;  %s2362_s15 = smov %s1797_s17 }
 0x527   : > { %s2360_s12 = smov %s2351_s25  ;;  %24 = sbr.rel (!%p22_p8) target bundleno = 13 (0xd), region = 154 }
 0x528   : > { %s2361_s13 = smov %s2352_s27 }
 0x52a   : > { %s2363_s17 = smov %s2355_s21 }
 0x52e   :  { %1144 = vsyncpa [#allocation7], 1 }
 0x52f   :  { %1146 = vsyncpa [#allocation7 + $0x1], 1 }
 0x530   :  { %1147 = vsyncpa [#allocation8], 1 }
 0x531   :  { %1149 = vsyncpa [#allocation8 + $0x1], 1 }

</bundles_post_ra>
